<compile_context>
chip_gen: v5e
topology: v5e:2x2
jax: 0.10.0
libtpu: 0.0.40
codegen_flags: <defaults>
</compile_context>

<pallas_src>
import functools
from typing import NamedTuple, Optional

import jax
import jax.numpy as jnp
from jax.experimental import pallas as pl
from jax.experimental.pallas import tpu as pltpu

_LANES = 128


# --------------------------------------------------------------------------
# Kernel
# --------------------------------------------------------------------------
def _sine_kernel(w0_ref, x_ref, o_ref):
    # Elementwise sin(w0 * x) on the current (tile_rows, 128) block.
    w0 = w0_ref[0]                                   # f32 scalar from SMEM
    x = x_ref[...].astype(jnp.float32)               # upcast rides free (mem-bound)
    o_ref[...] = jnp.sin(x * w0).astype(o_ref.dtype)


# --------------------------------------------------------------------------
# Chip-aware configuration
# --------------------------------------------------------------------------
class _ChipConfig(NamedTuple):
    block_bytes: int
    vmem_limit_bytes: Optional[int]
    multi_tc: bool


@functools.lru_cache(maxsize=1)
def _chip_config() -> _ChipConfig:
    kind = ""
    try:
        kind = jax.devices()[0].device_kind.lower()
    except Exception:
        pass
    if "v7" in kind or "7x" in kind:
        # v7x: 3.2 TB/s HBM, 64 MiB VMEM, 2 TensorCores.  8 MiB blocks ->
        # 32 MiB of double-buffered in+out, so raise the scoped-VMEM limit.
        return _ChipConfig(8 * 1024 * 1024, 48 * 1024 * 1024, True)
    if "v6" in kind:
        # v6e: single TC; 4 MiB blocks -> 16 MiB footprint, under the 32 MiB
        # default scoped limit.
        return _ChipConfig(4 * 1024 * 1024, None, False)
    # v5e / unknown: conservative — 2 MiB blocks -> 8 MiB footprint, under
    # the 16 MiB default scoped limit.
    return _ChipConfig(2 * 1024 * 1024, None, False)


def _sublane_multiple(itemsize: int) -> int:
    # Native sublane packing: 8 for 4-byte, 16 for 2-byte, 32 for 1-byte dtypes.
    return max(8, 32 // max(itemsize, 1))


def _choose_tile_rows(rows: int, sub_mult: int, itemsize: int,
                      cfg: _ChipConfig) -> int:
    target_rows = cfg.block_bytes // (_LANES * itemsize)
    target_rows = max(sub_mult, (target_rows // sub_mult) * sub_mult)
    tile = min(rows, target_rows)
    if cfg.multi_tc and rows > sub_mult:
        # Keep >= 4 grid steps for multi-MiB inputs (>= 2 blocks per core so
        # each TC can still overlap DMA with compute), >= 2 for mid-size ones.
        total_bytes = rows * _LANES * itemsize
        if total_bytes >= 4 * 1024 * 1024:
            min_steps = 4
        elif total_bytes >= 128 * 1024:
            min_steps = 2
        else:
            min_steps = 1
        cap = pl.cdiv(pl.cdiv(rows, min_steps), sub_mult) * sub_mult
        tile = min(tile, max(sub_mult, cap))
    if tile != rows:
        # Partial blocks must keep the (8,128)-divisibility of block_shape.
        tile = max(sub_mult, (tile // sub_mult) * sub_mult)
    return tile


# --------------------------------------------------------------------------
# pallas_call driver on a lane-dense (rows, 128) slab
# --------------------------------------------------------------------------
def _run_slab(x2d: jax.Array, w0_arr: jax.Array) -> jax.Array:
    cfg = _chip_config()
    rows = x2d.shape[0]
    itemsize = jnp.dtype(x2d.dtype).itemsize
    sub_mult = _sublane_multiple(itemsize)
    tile_rows = _choose_tile_rows(rows, sub_mult, itemsize, cfg)
    grid = (pl.cdiv(rows, tile_rows),)

    n_elems = rows * _LANES
    cost = pl.CostEstimate(flops=n_elems,
                           transcendentals=n_elems,
                           bytes_accessed=2 * n_elems * itemsize)

    cp_kwargs = dict(dimension_semantics=("parallel",))
    if cfg.vmem_limit_bytes is not None:
        cp_kwargs["vmem_limit_bytes"] = cfg.vmem_limit_bytes
    # NOTE: "parallel" lets the runtime shard the grid across v7x's two TCs.
    # TODO(synk): verify on v7x whether CORE_PARALLEL is needed instead.

    return pl.pallas_call(
        _sine_kernel,
        out_shape=jax.ShapeDtypeStruct((rows, _LANES), x2d.dtype),
        grid_spec=pltpu.PrefetchScalarGridSpec(
            num_scalar_prefetch=0,
            grid=grid,
            in_specs=[
                pl.BlockSpec(memory_space=pltpu.MemorySpace.SMEM),     # w0
                pl.BlockSpec((tile_rows, _LANES), lambda i: (i, 0)),   # x tile
            ],
            out_specs=pl.BlockSpec((tile_rows, _LANES), lambda i: (i, 0)),
        ),
        compiler_params=pltpu.CompilerParams(**cp_kwargs),
        cost_estimate=cost,
    )(w0_arr, x2d)


# --------------------------------------------------------------------------
# Public wrapper
# --------------------------------------------------------------------------
def _sine_impl(x: jax.Array, w0: jax.Array) -> jax.Array:
    orig_shape = x.shape
    orig_dtype = x.dtype
    n = int(x.size)

    if n == 0:
        return jnp.sin(w0 * x.astype(jnp.float32)).astype(orig_dtype)

    w0_arr = w0.reshape(1).astype(jnp.float32)
    flat = x.reshape(-1)                      # metadata-only under jit
    n_aligned = (n // _LANES) * _LANES

    if n_aligned == n:
        # Fast path: pure reshape to a lane-dense 2-D slab, no pad, no slice.
        out2d = _run_slab(flat.reshape(n // _LANES, _LANES), w0_arr)
        return out2d.reshape(orig_shape)

    if n_aligned == 0:
        # Tiny input (<128 elements): one padded (1,128) block through the
        # kernel; padding/slicing cost is < 512 bytes.
        padded = jnp.pad(flat, (0, _LANES - n))
        out = _run_slab(padded.reshape(1, _LANES), w0_arr)
        return out.reshape(-1)[:n].reshape(orig_shape)

    # General ragged path: Pallas kernel on the 128-aligned prefix, tiny
    # (<128-element) tail via XLA sin (fuses into the final assembly), so no
    # full-array pad or post-kernel slice is materialized.
    prefix_out = _run_slab(flat[:n_aligned].reshape(n_aligned // _LANES, _LANES),
                           w0_arr).reshape(-1)
    tail = flat[n_aligned:]
    tail_out = jnp.sin(w0 * tail.astype(jnp.float32)).astype(orig_dtype)
    return jnp.concatenate([prefix_out, tail_out]).reshape(orig_shape)


_sine_jit = jax.jit(_sine_impl)


def sine(x: jax.Array, w0: float = 1.0) -> jax.Array:
    """Apply sin(w0 * x) elementwise via a Pallas TPU kernel (jitted wrapper)."""
    return _sine_jit(x, jnp.asarray(w0, dtype=jnp.float32))


# --------------------------------------------------------------------------
# Self-test
# --------------------------------------------------------------------------
if __name__ == "__main__":
    key = jax.random.PRNGKey(0)
    k0, k1, k2, k3 = jax.random.split(key, 4)
    w0 = 30.0  # common SIREN first-layer frequency; module default is 1.0

    # Main test: typical NCHW activation, f32, fast (no-pad) path.
    x = jax.random.normal(k0, (2, 4, 16, 16), dtype=jnp.float32)
    out = jax.block_until_ready(sine(x, w0=w0))
    ref = jnp.sin(w0 * x)
    assert out.shape == x.shape and out.dtype == x.dtype
    assert jnp.allclose(out, ref, atol=1e-5, rtol=1e-5), "f32 mismatch vs reference"

    # Tiny ragged shape (<128 elements): single padded-block kernel path.
    xr = jax.random.normal(k1, (3, 5, 7), dtype=jnp.float32)
    outr = jax.block_until_ready(sine(xr, w0=w0))
    refr = jnp.sin(w0 * xr)
    assert outr.shape == xr.shape and outr.dtype == xr.dtype
    assert jnp.allclose(outr, refr, atol=1e-5, rtol=1e-5), "tiny ragged mismatch"

    # Larger ragged shape: aligned-prefix kernel + fused tail path.
    xg = jax.random.normal(k3, (5, 7, 13), dtype=jnp.float32)
    outg = jax.block_until_ready(sine(xg, w0=w0))
    refg = jnp.sin(w0 * xg)
    assert outg.shape == xg.shape and outg.dtype == xg.dtype
    assert jnp.allclose(outg, refg, atol=1e-5, rtol=1e-5), "ragged prefix mismatch"

    # bf16: kernel computes in f32 internally and casts back.
    xb = jax.random.normal(k2, (2, 4, 16, 16), dtype=jnp.bfloat16)
    outb = jax.block_until_ready(sine(xb, w0=w0))
    refb = jnp.sin(w0 * xb.astype(jnp.float32))
    assert outb.shape == xb.shape and outb.dtype == xb.dtype
    assert jnp.allclose(outb.astype(jnp.float32), refb, atol=2e-2, rtol=2e-2), \
        "bf16 mismatch vs reference"

    print("KERNEL_OK")
</pallas_src>

<mosaic_0001>
module attributes {stable_mosaic.version = 11 : i64} {
  func.func @_sine_kernel(%arg0: i32, %arg1: memref<1xf32, #tpu.memory_space<smem>>, %arg2: memref<16x128xf32, #tpu.memory_space<vmem>>, %arg3: memref<16x128xf32, #tpu.memory_space<vmem>>) attributes {dimension_semantics = [#tpu.dimension_semantics<parallel>], iteration_bounds = array<i64: 1>, scalar_prefetch = 0 : i64, scratch_operands = 0 : i64, tpu.core_type = #tpu.core_type<tc>, window_params = [{transform_indices = @transform_0, window_bounds = array<i64: 1>}, {transform_indices = @transform_1, window_bounds = array<i64: 16, 128>}, {transform_indices = @transform_2, window_bounds = array<i64: 16, 128>}]} {
    %c0 = arith.constant 0 : index
    %0 = memref.load %arg1[%c0] : memref<1xf32, #tpu.memory_space<smem>>
    %c0_0 = arith.constant 0 : index
    %c0_1 = arith.constant 0 : index
    %1 = vector.load %arg2[%c0_0, %c0_1] : memref<16x128xf32, #tpu.memory_space<vmem>>, vector<16x128xf32>
    %2 = vector.broadcast %0 : f32 to vector<16x128xf32>
    %3 = arith.mulf %1, %2 : vector<16x128xf32>
    %4 = math.sin %3 : vector<16x128xf32>
    %c0_2 = arith.constant 0 : index
    %c0_3 = arith.constant 0 : index
    %5 = vector.load %arg3[%c0_2, %c0_3] : memref<16x128xf32, #tpu.memory_space<vmem>>, vector<16x128xf32>
    tpu.vector_store %arg3[%c0_2, %c0_3], %4 {strides = array<i32>} : memref<16x128xf32, #tpu.memory_space<vmem>>, vector<16x128xf32>,
    return
  }
  func.func @transform_0(%arg0: i32) -> i32 {
    %c0_i32 = arith.constant 0 : i32
    %c0_i32_0 = arith.constant 0 : i32
    return %c0_i32 : i32
  }
  func.func @transform_1(%arg0: i32) -> (i32, i32) {
    %c0_i32 = arith.constant 0 : i32
    %c0_i32_0 = arith.constant 0 : i32
    return %arg0, %c0_i32 : i32, i32
  }
  func.func @transform_2(%arg0: i32) -> (i32, i32) {
    %c0_i32 = arith.constant 0 : i32
    %c0_i32_0 = arith.constant 0 : i32
    return %arg0, %c0_i32 : i32, i32
  }
}

</mosaic_0001>

<bundles_post_ra>
// kernel: _sine_impl.1
= control target key start
LH: loop header
LB: loop body
LE: loop exit
PB: predicated region body
PF: predicated region fallthrough
CT: control target
= control target key end

     0   :  { %v347_v26 = vmov 683565275   ;;  %v348_v28 = vmov 2475754826   ;;  %v349_v30 = vmov 2131351028   ;;  %s557_s0 = inlined_call_operand.<no memory space> [shape: f32[1], index: 0, kind: input, shape index: {}]   ;;  %s558_s1 = inlined_call_operand.vmem [shape: f32[16,128], index: 1, kind: input, shape index: {}]   ;;  %s559_s2 = inlined_call_operand.vmem [shape: f32[16,128], index: 2, kind: output, shape index: {}]  }
   0x1   :  { %v13_v0 = vld [vmem:[%s558_s1] sm:$0xff]  ;;  %v14_v1 = vld [vmem:[%s558_s1 + $0x8] sm:$0xff]  ;;  %v15_v2 = vstv %s557_s0  ;;  %v350_v32 = vmov 2102212464   ;;  %v351_v34 = vmov 920167782  }
   0x2   :  { %v378_v3 = vmul.f32 %v15_v2, %v13_v0  ;;  %v380_v4 = vmul.f32 %v15_v2, %v14_v1  ;;  %v352_v43 = vmov 1326507024  }
   0x4   :  { %v18_v5 = vand.u32 2147483647, %v378_v3  ;;  %v21_v6 = vand.u32 2139095040, %v378_v3  ;;  %v173_v7 = vand.u32 2147483647, %v380_v4  ;;  %v176_v8 = vand.u32 2139095040, %v380_v4 }
   0x6   :  { %v22_v9 = vshrl.u32 %v21_v6, 23  ;;  %v25_v10 = vand.u32 8388607, %v18_v5  ;;  %v177_v11 = vshrl.u32 %v176_v8, 23  ;;  %v180_v15 = vand.u32 8388607, %v173_v7 }
   0x8   :  { %v334_v12 = vadd.s32 4294967169, %v22_v9  ;;  %v26_v13 = vor.u32 8388608, %v25_v10  ;;  %v337_v14 = vadd.s32 4294967169, %v177_v11  ;;  %v181_v20 = vor.u32 8388608, %v180_v15 }
   0xa   :  { %v28_v16 = vadd.s32 1, %v334_v12  ;;  %v183_v17 = vadd.s32 1, %v337_v14  ;;  %v390_v19 = vshll.u32 %v26_v13, 8  ;;  %v400_v37 = vshll.u32 %v181_v20, 8 }
   0xc   :  { %vm29_vm0 = vcmp.gt.s32.totalorder %v28_v16, 0  ;;  %vm184_vm1 = vcmp.gt.s32.totalorder %v183_v17, 0  ;;  %v67_v36 = vand.u32 65535, %v390_v19  ;;  %v68_v41 = vshrl.u32 %v390_v19, 16 }
   0xd   :  { %v30_v18 = vsel %vm29_vm0, %v28_v16, 0  ;;  %v185_v22 = vsel %vm184_vm1, %v183_v17, 0 }
   0xe   :  { %v32_v21 = vand.u32 31, %v30_v18  ;;  %v392_v23 = vshrl.u32 %v30_v18, 5  ;;  %v394_v24 = vand.u32 31, %v185_v22  ;;  %v418_v54 = vshrl.u32 %v185_v22, 5 }
  0x10   :  { %v33_v25 = vsub.s32 32, %v32_v21  ;;  %v35_v27 = vshll.u32 %v347_v26, %v32_v21  ;;  %v38_v29 = vshll.u32 %v348_v28, %v32_v21  ;;  %v41_v31 = vshll.u32 %v349_v30, %v32_v21 }
  0x11   :  { %v44_v33 = vshll.u32 %v350_v32, %v32_v21  ;;  %v47_v35 = vshll.u32 %v351_v34, %v32_v21  ;;  %vm50_vm2 = vcmp.lt.s32.totalorder %v392_v23, 1  ;;  %vm53_vm3 = vcmp.lt.s32.totalorder %v392_v23, 4 }
  0x12   :  { %v36_v38 = vshrl.u32 %v348_v28, %v33_v25  ;;  %v39_v39 = vshrl.u32 %v349_v30, %v33_v25  ;;  %v42_v40 = vshrl.u32 %v350_v32, %v33_v25  ;;  %v45_v42 = vshrl.u32 %v351_v34, %v33_v25 }
  0x13   :  { %v48_v44 = vshrl.u32 %v352_v43, %v33_v25  ;;  %v409_v48 = vsub.s32 32, %v394_v24  ;;  %v34_v49 = vshrl.u32 %v347_v26, %v33_v25  ;;  %vm52_vm4 = vcmp.lt.s32.totalorder %v392_v23, 3 }
  0x14   :  { %v37_v45 = vor.u32 %v36_v38, %v35_v27  ;;  %v40_v46 = vor.u32 %v39_v39, %v38_v29  ;;  %v43_v47 = vor.u32 %v42_v40, %v41_v31  ;;  %v46_v50 = vor.u32 %v45_v42, %v44_v33 }
  0x15   :  { %v49_v51 = vor.u32 %v48_v44, %v47_v35  ;;  %vm51_vm5 = vcmp.lt.s32.totalorder %v392_v23, 2  ;;  %v190_v57 = vshll.u32 %v347_v26, %v394_v24  ;;  %v193_v58 = vshll.u32 %v348_v28, %v394_v24 }
  0x16   :  { %v58_v52 = vsel %vm50_vm2, %v37_v45, %v40_v46  ;;  %v62_v53 = vsel %vm50_vm2, %v40_v46, %v43_v47  ;;  %v59_v55 = vsel %vm53_vm3, %v46_v50, 920167782  ;;  %v55_v59 = vsel %vm53_vm3, %v43_v47, 2102212464 }
  0x17   :  { %v63_v56 = vsel %vm53_vm3, %v49_v51, 1326507024  ;;  %v60_v60 = vsel %vm52_vm4, %v43_v47, %v59_v55  ;;  %v191_v62 = vshrl.u32 %v348_v28, %v409_v48  ;;  %v54_v63 = vsel %vm50_vm2, %v34_v49, %v37_v45 }
  0x18   :  { %v64_v61 = vsel %vm52_vm4, %v46_v50, %v63_v56  ;;  %v61_v0 = vsel %vm51_vm5, %v58_v52, %v60_v60  ;;  %v194_v2 = vshrl.u32 %v349_v30, %v409_v48  ;;  %v56_v11 = vsel %vm52_vm4, %v40_v46, %v55_v59 }
  0x19   :  { %v65_v1 = vsel %vm51_vm5, %v62_v53, %v64_v61  ;;  %v91_v9 = vand.u32 65535, %v61_v0  ;;  %v92_v10 = vshrl.u32 %v61_v0, 16  ;;  %v443_v12 = vor.u32 %v191_v62, %v190_v57 }
  0x1a   :  { %v69_v6 = vand.u32 65535, %v65_v1  ;;  %v70_v8 = vshrl.u32 %v65_v1, 16  ;;  %v445_v13 = vor.u32 %v194_v2, %v193_v58  ;;  %v196_v14 = vshll.u32 %v349_v30, %v394_v24 }
  0x1b   :  { %v197_v18 = vshrl.u32 %v350_v32, %v409_v48  ;;  %v93_v21 = vmul.u32 %v91_v9, %v67_v36  ;;  %v94_v22 = vmul.u32 %v92_v10, %v67_v36  ;;  %v95_v25 = vmul.u32 %v91_v9, %v68_v41 }
  0x1c   :  { %v71_v15 = vmul.u32 %v69_v6, %v67_v36  ;;  %v72_v16 = vmul.u32 %v70_v8, %v67_v36  ;;  %v73_v17 = vmul.u32 %v69_v6, %v68_v41  ;;  %v74_v20 = vmul.u32 %v70_v8, %v68_v41 }
  0x1d   :  { %v96_v31 = vmul.u32 %v92_v10, %v68_v41  ;;  %v97_v35 = vshll.u32 %v94_v22, 16  ;;  %v98_v38 = vshrl.u32 %v94_v22, 16  ;;  %v99_v39 = vshll.u32 %v95_v25, 16 }
  0x1e   :  { %v75_v27 = vshll.u32 %v72_v16, 16  ;;  %v76_v28 = vshrl.u32 %v72_v16, 16  ;;  %v77_v29 = vshll.u32 %v73_v17, 16  ;;  %v78_v33 = vshrl.u32 %v73_v17, 16 }
  0x1f   :  { %v100_v40 = vshrl.u32 %v95_v25, 16  ;;  %v199_v42 = vshll.u32 %v350_v32, %v394_v24  ;;  %v353_v44 = vmov 0   ;;  %vm101_vm7 = vc.u32 %v93_v21, %v97_v35 }
  0x20   :  { %vm79_vm6 = vc.u32 %v71_v15, %v75_v27  ;;  %v81_v30 = vadd.s32 %v75_v27, %v71_v15  ;;  %v103_v36 = vadd.s32 %v97_v35, %v93_v21  ;;  %v200_v46 = vshrl.u32 %v351_v34, %v409_v48 }
  0x21   :  { %v80_v45 = vsel %vm79_vm6, 1, %v353_v44  ;;  %v102_v41 = vsel %vm101_vm7, 1, %v353_v44  ;;  %v202_v49 = vshll.u32 %v351_v34, %v394_v24  ;;  %v198_v32 = vor.u32 %v197_v18, %v196_v14 }
  0x22   :  { %v82_v47 = vadd.s32 %v80_v45, %v74_v20  ;;  %vm83_vm8 = vc.u32 %v81_v30, %v77_v29  ;;  %v104_v51 = vadd.s32 %v102_v41, %v96_v31  ;;  %vm105_vm9 = vc.u32 %v103_v36, %v99_v39 }
  0x23   :  { %v84_v50 = vsel %vm83_vm8, 1, %v353_v44  ;;  %v106_v53 = vsel %vm105_vm9, 1, %v353_v44  ;;  %v201_v55 = vor.u32 %v200_v46, %v199_v42  ;;  %v203_v56 = vshrl.u32 %v352_v43, %v409_v48 }
  0x24   :  { %v86_v52 = vadd.s32 %v84_v50, %v82_v47  ;;  %v462_v57 = vadd.s32 %v103_v36, %v99_v39  ;;  %v108_v58 = vadd.s32 %v106_v53, %v104_v51  ;;  %vm205_vm10 = vcmp.lt.s32.totalorder %v418_v54, 1 }
  0x25   :  { %vm207_vm11 = vcmp.lt.s32.totalorder %v418_v54, 3  ;;  %v204_v34 = vor.u32 %v203_v56, %v202_v49  ;;  %vm206_vm12 = vcmp.lt.s32.totalorder %v418_v54, 2  ;;  %vm208_vm13 = vcmp.lt.s32.totalorder %v418_v54, 4 }
  0x26   :  { %v87_v24 = vadd.s32 %v86_v52, %v76_v28  ;;  %v57_v59 = vsel %vm51_vm5, %v54_v63, %v56_v11  ;;  %v109_v60 = vadd.s32 %v108_v58, %v98_v38  ;;  %v213_v43 = vsel %vm205_vm10, %v443_v12, %v445_v13 }
  0x27   :  { %v214_v61 = vsel %vm208_vm13, %v201_v55, 920167782  ;;  %v217_v1 = vsel %vm205_vm10, %v445_v13, %v198_v32  ;;  %v222_v23 = vand.u32 65535, %v400_v37  ;;  %v218_v6 = vsel %vm208_vm13, %v204_v34, 1326507024 }
  0x28   :  { %v476_v62 = vadd.s32 %v87_v24, %v78_v33  ;;  %v215_v0 = vsel %vm207_vm11, %v198_v32, %v214_v61  ;;  %v110_v63 = vadd.s32 %v109_v60, %v100_v40  ;;  %v223_v8 = vshrl.u32 %v400_v37, 16 }
  0x29   :  { %v216_v2 = vsel %vm206_vm12, %v213_v43, %v215_v0  ;;  %v111_v9 = vmul.u32 %v390_v19, %v57_v59  ;;  %v219_v10 = vsel %vm207_vm11, %v201_v55, %v218_v6  ;;  %v189_v21 = vshrl.u32 %v347_v26, %v409_v48 }
  0x2a   :  { %vm113_vm14 = vc.u32 %v476_v62, %v462_v57  ;;  %v246_v11 = vand.u32 65535, %v216_v2  ;;  %v114_v14 = vadd.s32 1, %v110_v63  ;;  %v220_v15 = vsel %vm206_vm12, %v217_v1, %v219_v10 }
  0x2b   :  { %v247_v16 = vshrl.u32 %v216_v2, 16  ;;  %v224_v17 = vand.u32 65535, %v220_v15  ;;  %v225_v18 = vshrl.u32 %v220_v15, 16  ;;  %v210_v38 = vsel %vm208_vm13, %v198_v32, 2102212464 }
  0x2c   :  { %v115_v20 = vsel %vm113_vm14, %v114_v14, %v110_v63  ;;  %v250_v19 = vmul.u32 %v246_v11, %v223_v8  ;;  %v248_v29 = vmul.u32 %v246_v11, %v222_v23  ;;  %v209_v40 = vsel %vm205_vm10, %v189_v21, %v443_v12 }
  0x2d   :  { %v249_v22 = vmul.u32 %v247_v16, %v222_v23  ;;  %v116_v25 = vadd.s32 %v115_v20, %v111_v9  ;;  %v226_v27 = vmul.u32 %v224_v17, %v222_v23  ;;  %v227_v28 = vmul.u32 %v225_v18, %v222_v23 }
  0x2e   :  { %v228_v31 = vmul.u32 %v224_v17, %v223_v8  ;;  %v229_v39 = vmul.u32 %v225_v18, %v223_v8  ;;  %v251_v26 = vmul.u32 %v247_v16, %v223_v8  ;;  %v254_v48 = vshll.u32 %v250_v19, 16 }
  0x2f   :  { %v252_v33 = vshll.u32 %v249_v22, 16  ;;  %v117_v35 = vadd.s32 536870912, %v116_v25  ;;  %v230_v30 = vshll.u32 %v227_v28, 16  ;;  %v211_v46 = vsel %vm207_vm11, %v445_v13, %v210_v38 }
  0x30   :  { %v232_v42 = vshll.u32 %v228_v31, 16  ;;  %v231_v12 = vshrl.u32 %v227_v28, 16  ;;  %v253_v52 = vshrl.u32 %v249_v22, 16  ;;  %v233_v56 = vshrl.u32 %v228_v31, 16 }
  0x31   :  { %v503_v45 = vshrl.u32 %v117_v35, 30  ;;  %vm234_vm15 = vc.u32 %v226_v27, %v230_v30  ;;  %v236_v36 = vadd.s32 %v230_v30, %v226_v27  ;;  %vm256_vm0 = vc.u32 %v248_v29, %v252_v33 }
  0x32   :  { %v235_v47 = vsel %vm234_vm15, 1, %v353_v44  ;;  %v257_v41 = vsel %vm256_vm0, 1, %v353_v44  ;;  %v258_v49 = vadd.s32 %v252_v33, %v248_v29  ;;  %v255_v24 = vshrl.u32 %v250_v19, 16 }
  0x33   :  { %v119_v50 = vshll.u32 %v503_v45, 30  ;;  %v237_v51 = vadd.s32 %v235_v47, %v229_v39  ;;  %vm238_vm1 = vc.u32 %v236_v36, %v232_v42  ;;  %v259_v53 = vadd.s32 %v257_v41, %v251_v26 }
  0x34   :  { %v239_v32 = vsel %vm238_vm1, 1, %v353_v44  ;;  %vm260_vm2 = vc.u32 %v258_v49, %v254_v48  ;;  %v262_v43 = vadd.s32 %v258_v49, %v254_v48  ;;  %v212_v61 = vsel %vm206_vm12, %v209_v40, %v211_v46 }
  0x35   :  { %v120_v55 = vsub.s32 %v116_v25, %v119_v50  ;;  %v241_v58 = vadd.s32 %v239_v32, %v237_v51  ;;  %v261_v13 = vsel %vm260_vm2, 1, %v353_v44  ;;  %v266_v6 = vmul.u32 %v400_v37, %v212_v61 }
  0x36   :  { %v263_v34 = vadd.s32 %v261_v13, %v259_v53  ;;  %v112_v44 = vadd.s32 %v462_v57, %v476_v62  ;;  %v142_v31 = vsub.s32 4, %v503_v45  ;;  %vm20_vm7 = vcmp.lt.s32.totalorder %v378_v3, 0 }
  0x37   :  { %vm121_vm3 = vcmp.lt.s32.totalorder %v120_v55, 0  ;;  %v122_v59 = vsub.s32 0, %v120_v55  ;;  %v242_v60 = vadd.s32 %v241_v58, %v231_v12  ;;  %vm525_vm8 = vcmp.le.f32.partialorder %v18_v5, 0.7853982 }
  0x38   :  { %v264_v0 = vadd.s32 %v263_v34, %v253_v52  ;;  %v143_v40 = vsel %vm20_vm7, %v142_v31, %v503_v45  ;;  %vm175_vm11 = vcmp.lt.s32.totalorder %v380_v4, 0  ;;  %vm539_vm13 = vcmp.le.f32.partialorder %v173_v7, 0.7853982 }
  0x39   :  { %v123_v1 = vsel %vm121_vm3, %v122_v59, %v120_v55  ;;  %v243_v23 = vadd.s32 %v242_v60, %v233_v56  ;;  %v145_v46 = vsel %vm525_vm8, 0, %v143_v40  ;;  %vm161_vm15 = vweird.f32 %v378_v3 }
  0x3a   :  { %v124_v63 = vclz %v123_v1  ;;  %v265_v2 = vadd.s32 %v264_v0, %v255_v24  ;;  %v162_v52 = vadd.s32 3, %v145_v46  ;;  %vm316_vm3 = vweird.f32 %v380_v4 }
  0x3b   :  { %vm268_vm4 = vc.u32 %v243_v23, %v262_v43  ;;  %v267_v36 = vadd.s32 %v262_v43, %v243_v23 }
  0x3c   :  { %v335_v8 = vadd.s32 4294967294, %v124_v63  ;;  %v269_v9 = vadd.s32 1, %v265_v2  ;;  %v163_v59 = vand.u32 3, %v162_v52 }
  0x3e   :  { %vm336_vm5 = vcmp.lt.s32.totalorder %v335_v8, 0  ;;  %v270_v10 = vsel %vm268_vm4, %v269_v9, %v265_v2  ;;  %vm168_vm10 = vcmp.eq.s32.totalorder %v163_v59, 2  ;;  %vm165_vm12 = vcmp.eq.s32.totalorder %v163_v59, 0 }
  0x3f   :  { %v127_v11 = vsel %vm336_vm5, 0, %v335_v8  ;;  %v271_v14 = vadd.s32 %v270_v10, %v266_v6  ;;  %vm164_vm14 = vcmp.lt.s32.totalorder %v163_v59, 2 }
  0x40   :  { %v128_v15 = vsub.s32 32, %v127_v11  ;;  %v129_v54 = vshll.u32 %v120_v55, %v127_v11  ;;  %v132_v16 = vsub.s32 4294967266, %v127_v11 }
  0x41   :  { %v272_v17 = vadd.s32 536870912, %v271_v14 }
  0x42   :  { %v130_v18 = vshrl.u32 %v112_v44, %v128_v15  ;;  %v133_v20 = vadd.s32 127, %v132_v16 }
  0x43   :  { %v518_v21 = vshrl.u32 %v272_v17, 30 }
  0x44   :  { %v131_v22 = vor.u32 %v130_v18, %v129_v54  ;;  %v134_v37 = vshll.u32 %v133_v20, 23 }
  0x45   :  { %v274_v19 = vshll.u32 %v518_v21, 30  ;;  %v297_v9 = vsub.s32 4, %v518_v21 }
  0x46   :  { %v135_v25 = vor.u32 4788187, %v134_v37  ;;  %v138_v27 = vcvt.s32.f32 %v131_v22 }
  0x47   :  { %v275_v28 = vsub.s32 %v271_v14, %v274_v19  ;;  %v298_v16 = vsel %vm175_vm11, %v297_v9, %v518_v21 }
  0x48   :  { %v136_v57 = vand.u32 2147483647, %v135_v25  ;;  %v300_v22 = vsel %vm539_vm13, 0, %v298_v16 }
  0x49   :  { %vm276_vm6 = vcmp.lt.s32.totalorder %v275_v28, 0  ;;  %v277_v62 = vsub.s32 0, %v275_v28 }
  0x4a   :  { %v139_v29 = vmul.f32 %v138_v27, %v136_v57  ;;  %v317_v27 = vadd.s32 3, %v300_v22 }
  0x4b   :  { %v278_v33 = vsel %vm276_vm6, %v277_v62, %v275_v28 }
  0x4c   :  { %v140_v38 = vxor.u32 2147483648, %v139_v29  ;;  %v279_v39 = vclz %v278_v33 }
  0x4e   :  { %v141_v30 = vsel %vm20_vm7, %v140_v38, %v139_v29  ;;  %v338_v42 = vadd.s32 4294967294, %v279_v39  ;;  %v318_v29 = vand.u32 3, %v317_v27 }
  0x4f   :  { %v144_v26 = vsel %vm525_vm8, %v378_v3, %v141_v30 }
  0x50   :  { %v146_v48 = vmul.f32 %v144_v26, %v144_v26  ;;  %vm339_vm9 = vcmp.lt.s32.totalorder %v338_v42, 0  ;;  %vm323_vm0 = vcmp.eq.s32.totalorder %v318_v29, 2  ;;  %vm320_vm1 = vcmp.eq.s32.totalorder %v318_v29, 0 }
  0x51   :  { %v282_v5 = vsel %vm339_vm9, 0, %v338_v42  ;;  %vm319_vm2 = vcmp.lt.s32.totalorder %v318_v29, 2 }
  0x52   :  { %v147_v47 = vmul.f32 -0.001358992, %v146_v48  ;;  %v154_v41 = vmul.f32 -0.00019511016, %v146_v48  ;;  %v283_v49 = vsub.s32 32, %v282_v5  ;;  %v284_v50 = vshll.u32 %v275_v28, %v282_v5 }
  0x53   :  { %v287_v12 = vsub.s32 4294967266, %v282_v5 }
  0x54   :  { %v148_v51 = vadd.f32 0.041655596, %v147_v47  ;;  %v155_v32 = vadd.f32 0.008332121, %v154_v41  ;;  %v285_v45 = vshrl.u32 %v267_v36, %v283_v49 }
  0x55   :  { %v288_v53 = vadd.s32 127, %v287_v12 }
  0x56   :  { %v149_v55 = vmul.f32 %v148_v51, %v146_v48  ;;  %v156_v56 = vmul.f32 %v155_v32, %v146_v48  ;;  %v286_v58 = vor.u32 %v285_v45, %v284_v50 }
  0x57   :  { %v289_v13 = vshll.u32 %v288_v53, 23 }
  0x58   :  { %v150_v24 = vadd.f32 -0.4999988, %v149_v55  ;;  %v157_v34 = vadd.f32 -0.16666654, %v156_v56  ;;  %v293_v43 = vcvt.s32.f32 %v286_v58 }
  0x59   :  { %v290_v60 = vor.u32 4788187, %v289_v13 }
  0x5a   :  { %v151_v61 = vmul.f32 %v150_v24, %v146_v48  ;;  %v158_v0 = vmul.f32 %v157_v34, %v146_v48 }
  0x5b   :  { %v291_v1 = vand.u32 2147483647, %v290_v60 }
  0x5c   :  { %v152_v23 = vadd.f32 1.0, %v151_v61  ;;  %v159_v63 = vadd.f32 1.0, %v158_v0 }
  0x5d   :  { %v294_v2 = vmul.f32 %v293_v43, %v291_v1 }
  0x5e   :  { %v160_v6 = vmul.f32 %v159_v63, %v144_v26  ;;  %v169_v8 = vxor.u32 2147483648, %v152_v23 }
  0x5f   :  { %v295_v10 = vxor.u32 2147483648, %v294_v2 }
  0x60   :  { %v166_v11 = vxor.u32 2147483648, %v160_v6  ;;  %v170_v14 = vsel %vm168_vm10, %v169_v8, %v160_v6 }
  0x61   :  { %v296_v15 = vsel %vm175_vm11, %v295_v10, %v294_v2 }
  0x62   :  { %v167_v54 = vsel %vm165_vm12, %v152_v23, %v166_v11  ;;  %v299_v17 = vsel %vm539_vm13, %v380_v4, %v296_v15 }
  0x63   :  { %v171_v18 = vsel %vm164_vm14, %v167_v54, %v170_v14  ;;  %v301_v20 = vmul.f32 %v299_v17, %v299_v17 }
  0x64   :  { %v172_v7 = vsel %vm161_vm15, nan, %v171_v18 }
  0x65   :  { %v302_v37 = vmul.f32 -0.001358992, %v301_v20  ;;  %v309_v19 = vmul.f32 -0.00019511016, %v301_v20  ;;  %328 = vst [vmem:[%s559_s2] sm:$0xff] %v172_v7 }
  0x67   :  { %v303_v3 = vadd.f32 0.041655596, %v302_v37  ;;  %v310_v25 = vadd.f32 0.008332121, %v309_v19 }
  0x69   :  { %v304_v21 = vmul.f32 %v303_v3, %v301_v20  ;;  %v311_v28 = vmul.f32 %v310_v25, %v301_v20 }
  0x6b   :  { %v305_v57 = vadd.f32 -0.4999988, %v304_v21  ;;  %v312_v62 = vadd.f32 -0.16666654, %v311_v28 }
  0x6d   :  { %v306_v31 = vmul.f32 %v305_v57, %v301_v20  ;;  %v313_v33 = vmul.f32 %v312_v62, %v301_v20 }
  0x6f   :  { %v307_v35 = vadd.f32 1.0, %v306_v31  ;;  %v314_v38 = vadd.f32 1.0, %v313_v33 }
  0x71   :  { %v315_v39 = vmul.f32 %v314_v38, %v299_v17  ;;  %v324_v30 = vxor.u32 2147483648, %v307_v35 }
  0x73   :  { %v321_v40 = vxor.u32 2147483648, %v315_v39  ;;  %v325_v42 = vsel %vm323_vm0, %v324_v30, %v315_v39 }
  0x75   :  { %v322_v26 = vsel %vm320_vm1, %v307_v35, %v321_v40 }
  0x76   :  { %v326_v48 = vsel %vm319_vm2, %v322_v26, %v325_v42 }
  0x77   :  { %v327_v36 = vsel %vm316_vm3, nan, %v326_v48 }
  0x78   :  { %329 = vst [vmem:[%s559_s2 + $0x8] sm:$0xff] %v327_v36 }

</bundles_post_ra>
